<compile_context>
chip_gen: v6e
topology: v6e:2x2x1
jax: 0.10.0
libtpu: 0.0.40
codegen_flags: <defaults>
</compile_context>

<pallas_src>
import math
import numpy as np

import jax
import jax.numpy as jnp
from jax.experimental import pallas as pl
from jax.experimental.pallas import tpu as pltpu


# ---------------------------------------------------------------------------
# DCT filter construction (deterministic, mirrors the nn.Module __init__)
# ---------------------------------------------------------------------------
def _build_filter(pos, freq, POS):
    result = math.cos(math.pi * freq * (pos + 0.5) / POS) / math.sqrt(POS)
    if freq == 0:
        return result
    return result * math.sqrt(2)


def get_dct_filter(height, width, mapper_x, mapper_y, channel):
    assert len(mapper_x) == len(mapper_y)
    dct_filter = np.zeros((channel, height, width), dtype=np.float32)
    c_part = channel // len(mapper_x)
    for i, (u_x, v_y) in enumerate(zip(mapper_x, mapper_y)):
        for t_x in range(height):
            for t_y in range(width):
                dct_filter[i * c_part:(i + 1) * c_part, t_x, t_y] = (
                    _build_filter(t_x, u_x, height) * _build_filter(t_y, v_y, width)
                )
    return jnp.asarray(dct_filter)


# ---------------------------------------------------------------------------
# Padding / VMEM sizing helpers (padding-aware per perf review)
# ---------------------------------------------------------------------------
def _round_up(x, m):
    return (x + m - 1) // m * m


def _sublane_multiple(dtype):
    # (8, 128) native tile at 32-bit; sub-32-bit dtypes pack along sublanes
    # (8 for f32, 16 for bf16, 32 for int8).
    return max(8, 32 // jnp.dtype(dtype).itemsize)


def _padded_2d_bytes(rows, cols, dtype):
    """Real VMEM footprint of the trailing (rows, cols) dims of a block."""
    return (_round_up(rows, _sublane_multiple(dtype))
            * _round_up(cols, 128)
            * jnp.dtype(dtype).itemsize)


def _vmem_budgets():
    """Per-generation (x-tile budget, scoped-VMEM cap) in bytes."""
    vmem_cap = 64 << 20  # conservative default = v7x per-TC VMEM
    try:
        info = pltpu.get_tpu_info()
        vmem_cap = int(getattr(info, "vmem_capacity_bytes", vmem_cap))
    except Exception:
        pass
    if vmem_cap <= (64 << 20):
        # v7x: 64 MiB physical / 32 MiB default scoped.  ~10 MiB tiles already
        # make the ~0.35 us/step overhead negligible vs the per-step DMA time.
        return 10 << 20, 44 << 20
    # v5e / v6e: 128 MiB VMEM -> keep the larger tiles and cap.
    return 20 << 20, 96 << 20


def _pick_batch_tile(n_batch, bytes_per_row_padded, x_budget):
    """Rows per grid step: fill the budget, but keep ~8 grid steps when N allows."""
    tn = max(1, x_budget // (2 * bytes_per_row_padded))   # double-buffered x tile
    tn = min(tn, n_batch)
    # Several steps -> both v7x TensorCores get work AND double-buffering has
    # something to overlap (>= ~4 steps per core when the batch is big enough).
    target_steps = min(8, max(1, n_batch // 8))
    if target_steps > 1:
        tn = min(tn, _round_up(pl.cdiv(n_batch, target_steps), 8))
    if tn < n_batch:
        # Multiple of 8 -> sublane-dense blocks / valid BlockSpec tiling.
        tn = max(8, (tn // 8) * 8)
        tn = min(tn, n_batch)
    return int(tn)


# ---------------------------------------------------------------------------
# Kernels: elementwise multiply + spatial reduction over a batch tile
# ---------------------------------------------------------------------------
def _dct_reduce_kernel_hw_lanes(x_ref, w_ref, o_ref):
    # NCHW layout: x_ref (TN, C, HW), w_ref (C, HW), o_ref (TN, C).
    # Only the small weight is cast to f32; x promotes per-vreg in the multiply
    # so the whole x tile is never duplicated as an f32 copy.
    w = w_ref[...].astype(jnp.float32)
    prod = x_ref[...] * w[None, :, :]                       # VPU, f32 result
    o_ref[...] = jnp.sum(prod, axis=-1).astype(o_ref.dtype)  # lane reduction


def _dct_reduce_kernel_c_lanes(x_ref, w_ref, o_ref):
    # NHWC layout: x_ref (TN, HW, C), w_ref (HW, C), o_ref (TN, C).
    # C on lanes => dense vregs even for HW=49, reduction over the sublane axis
    # is cheap VPU adds, and the (TN, C) store is lane-dense when C >= 128.
    w = w_ref[...].astype(jnp.float32)
    prod = x_ref[...] * w[None, :, :]
    o_ref[...] = jnp.sum(prod, axis=1).astype(o_ref.dtype)


# ---------------------------------------------------------------------------
# pallas_call wrapper shared by both layouts
# ---------------------------------------------------------------------------
def _dct_pallas_call(x3, w2, kernel, n_channels):
    N, A, B = x3.shape                      # (C, HW) or (HW, C) trailing dims
    assert w2.shape == (A, B)

    x_budget, vmem_cap = _vmem_budgets()
    bytes_per_row = _padded_2d_bytes(A, B, x3.dtype)        # one batch row, padded
    w_bytes = _padded_2d_bytes(A, B, w2.dtype)              # padded weight buffer
    # Reserve the (double-buffered) resident weight before sizing x tiles.
    x_budget = max(1 << 20, x_budget - 2 * w_bytes)

    TN = _pick_batch_tile(N, bytes_per_row, x_budget)
    grid_n = pl.cdiv(N, TN)

    out_bytes = _padded_2d_bytes(TN, n_channels, x3.dtype)
    vmem_needed = (2 * TN * bytes_per_row      # double-buffered x tile
                   + 2 * w_bytes               # weight (default double-buffer)
                   + 2 * out_bytes             # output blocks
                   + (2 << 20))                # compiler-internal scratch margin
    vmem_limit = int(min(max(vmem_needed, 4 << 20), vmem_cap))

    itemsize = jnp.dtype(x3.dtype).itemsize
    cost = pl.CostEstimate(
        flops=2 * N * A * B,                   # mul + add per element
        transcendentals=0,
        bytes_accessed=(N * A * B + A * B + N * n_channels) * itemsize,
    )

    return pl.pallas_call(
        kernel,
        out_shape=jax.ShapeDtypeStruct((N, n_channels), x3.dtype),
        grid_spec=pltpu.PrefetchScalarGridSpec(
            num_scalar_prefetch=0,
            grid=(grid_n,),
            in_specs=[
                pl.BlockSpec((TN, A, B), lambda n: (n, 0, 0)),
                pl.BlockSpec((A, B), lambda n: (0, 0)),      # resident weight
            ],
            out_specs=pl.BlockSpec((TN, n_channels), lambda n: (n, 0)),
        ),
        compiler_params=pltpu.CompilerParams(
            dimension_semantics=("parallel",),
            vmem_limit_bytes=vmem_limit,
        ),
        cost_estimate=cost,
    )(x3, w2)


def multispectral_dct_layer(x, weight):
    """NCHW path matching the PyTorch module. x (N,C,H,W), weight (C,H,W) -> (N,C)."""
    N, C, H, W = x.shape
    assert weight.shape == (C, H, W)
    HW = H * W
    return _dct_pallas_call(x.reshape(N, C, HW), weight.reshape(C, HW),
                            _dct_reduce_kernel_hw_lanes, C)


def multispectral_dct_layer_nhwc(x_nhwc, weight):
    """Channels-last path (lane-dense for 7x7 spatials).

    x_nhwc (N,H,W,C), weight (C,H,W) -> (N,C).  Use this when the producer
    already emits NHWC; no wrapper-side transpose of x is performed.
    """
    N, H, W, C = x_nhwc.shape
    assert weight.shape == (C, H, W)
    HW = H * W
    w_hwc = jnp.transpose(weight.reshape(C, HW), (1, 0))    # tiny one-time transpose
    return _dct_pallas_call(x_nhwc.reshape(N, HW, C), w_hwc,
                            _dct_reduce_kernel_c_lanes, C)


# ---------------------------------------------------------------------------
# Demo / correctness check
# ---------------------------------------------------------------------------
if __name__ == "__main__":
    # Small config consistent with the module: H=W=16, channel=4,
    # two frequency components (mapper len 2, c_part = 2).
    N, C, H, W = 2, 4, 16, 16
    mapper_x = [0, 0]
    mapper_y = [0, 1]

    weight = get_dct_filter(H, W, mapper_x, mapper_y, C)

    key = jax.random.PRNGKey(0)
    x = jax.random.normal(key, (N, C, H, W), dtype=jnp.float32)

    # Pure-JAX reference (same math as the PyTorch forward).
    ref = jnp.sum(x * weight[None], axis=(2, 3))

    # NCHW path (matches the PyTorch module layout).
    out = jax.block_until_ready(multispectral_dct_layer(x, weight))
    assert out.shape == (N, C)
    np.testing.assert_allclose(np.asarray(out), np.asarray(ref),
                               rtol=1e-5, atol=1e-5)

    # NHWC path (transpose here is only to build a test input; real producers
    # would emit channels-last directly).
    x_nhwc = jnp.transpose(x, (0, 2, 3, 1))
    out2 = jax.block_until_ready(multispectral_dct_layer_nhwc(x_nhwc, weight))
    np.testing.assert_allclose(np.asarray(out2), np.asarray(ref),
                               rtol=1e-5, atol=1e-5)

    print("KERNEL_OK")
</pallas_src>

<mosaic_0001>
module attributes {stable_mosaic.version = 11 : i64} {
  func.func @_dct_reduce_kernel_hw_lanes(%arg0: i32, %arg1: memref<2x4x256xf32, #tpu.memory_space<vmem>>, %arg2: memref<4x256xf32, #tpu.memory_space<vmem>>, %arg3: memref<2x4xf32, #tpu.memory_space<vmem>>) attributes {dimension_semantics = [#tpu.dimension_semantics<parallel>], iteration_bounds = array<i64: 1>, scalar_prefetch = 0 : i64, scratch_operands = 0 : i64, tpu.core_type = #tpu.core_type<tc>, window_params = [{transform_indices = @transform_0, window_bounds = array<i64: 2, 4, 256>}, {pipeline_mode = #tpu.pipeline_mode<synchronous>, transform_indices = @transform_1, window_bounds = array<i64: 4, 256>}, {transform_indices = @transform_2, window_bounds = array<i64: 2, 4>}]} {
    %c0 = arith.constant 0 : index
    %c0_0 = arith.constant 0 : index
    %0 = vector.load %arg2[%c0, %c0_0] : memref<4x256xf32, #tpu.memory_space<vmem>>, vector<4x256xf32>
    %c0_1 = arith.constant 0 : index
    %c0_2 = arith.constant 0 : index
    %c0_3 = arith.constant 0 : index
    %1 = vector.load %arg1[%c0_1, %c0_2, %c0_3] : memref<2x4x256xf32, #tpu.memory_space<vmem>>, vector<2x4x256xf32>
    %2 = vector.shape_cast %0 : vector<4x256xf32> to vector<1x4x256xf32>
    %3 = vector.broadcast %2 : vector<1x4x256xf32> to vector<2x4x256xf32>
    %4 = arith.mulf %1, %3 : vector<2x4x256xf32>
    %cst = arith.constant dense<0.000000e+00> : vector<2x4xf32>
    %5 = vector.multi_reduction <add>, %4, %cst [2] : vector<2x4x256xf32> to vector<2x4xf32>
    %c0_4 = arith.constant 0 : index
    %c0_5 = arith.constant 0 : index
    %6 = vector.load %arg3[%c0_4, %c0_5] : memref<2x4xf32, #tpu.memory_space<vmem>>, vector<2x4xf32>
    tpu.vector_store %arg3[%c0_4, %c0_5], %5 {strides = array<i32>} : memref<2x4xf32, #tpu.memory_space<vmem>>, vector<2x4xf32>,
    return
  }
  func.func @transform_0(%arg0: i32) -> (i32, i32, i32) {
    %c0_i32 = arith.constant 0 : i32
    %c0_i32_0 = arith.constant 0 : i32
    %c0_i32_1 = arith.constant 0 : i32
    return %arg0, %c0_i32, %c0_i32_0 : i32, i32, i32
  }
  func.func @transform_1(%arg0: i32) -> (i32, i32) {
    %c0_i32 = arith.constant 0 : i32
    %c0_i32_0 = arith.constant 0 : i32
    %c0_i32_1 = arith.constant 0 : i32
    return %c0_i32, %c0_i32_0 : i32, i32
  }
  func.func @transform_2(%arg0: i32) -> (i32, i32) {
    %c0_i32 = arith.constant 0 : i32
    %c0_i32_0 = arith.constant 0 : i32
    return %arg0, %c0_i32 : i32, i32
  }
}

</mosaic_0001>

<bundles_post_ra>
// kernel: tpu_custom_call.1
= control target key start
LH: loop header
LB: loop body
LE: loop exit
PB: predicated region body
PF: predicated region fallthrough
CT: control target
= control target key end

     0   :  { %7 = vsyncpa [#allocation3], 0  ;;  %s193_s0 = inlined_call_operand.hbm [shape: f32[2,4,256], index: 0, kind: input, shape index: {}]   ;;  %s194_s1 = inlined_call_operand.hbm [shape: f32[4,256], index: 1, kind: input, shape index: {}]   ;;  %s195_s2 = inlined_call_operand.hbm [shape: f32[2,4], index: 2, kind: output, shape index: {}]  }
   0x1   :  { %8 = vsyncpa [#allocation6], 0 }
   0x2   :  { %9 = vsyncpa [#allocation4], 0  ;;  %s164_s9 = smov [#allocation2]  }
   0x3   :  { %s15_s10 = sshll.u32 %s164_s9, 4  ;;  %s16_s10 = int_to_ptr.vmem [resolvable:$true] %s15_s10 }
   0x4   :  { %s106_s11 = scalar_lea.vmem %s16_s10, 256  ;;  %p111_p1 = scmp.lt.s32.totalorder %s16_s10, %s16_s10 }
   0x5   :  { %p107_p0 = scmp.ne.s32.totalorder %s16_s10, %s106_s11  ;;  %p112_p2 = scmp.lt.s32.totalorder %s106_s11, %s106_s11 }
   0x7   :  { %p113_p3 = por %p112_p2, %p111_p1 }
   0x9   :  { %p114_p4 = pnand %p113_p3, %p107_p0 }
   0xb   :  { %117 = shalt.err (!%p114_p4)
}
   0xc   :  { %s165_s12 = smov 128   ;;  %s166_s13 = smov 8  }
   0xd   :  { %21 = dma.hbm_to_vmem [thread:$0]  %s193_s0, 256, %s16_s10, [#allocation3], %s165_s12, %s165_s12, %s166_s13  }
   0xe   :  { %s167_s16 = smov [#allocation5]  }
   0xf   :  { %s28_s17 = sshll.u32 %s167_s16, 4  ;;  %s29_s17 = int_to_ptr.vmem [resolvable:$true] %s28_s17 }
  0x10   :  { %s126_s18 = scalar_lea.vmem %s29_s17, 128  ;;  %p131_p6 = scmp.lt.s32.totalorder %s29_s17, %s29_s17 }
  0x11   :  { %p127_p5 = scmp.ne.s32.totalorder %s29_s17, %s126_s18  ;;  %p132_p7 = scmp.lt.s32.totalorder %s126_s18, %s126_s18 }
  0x13   :  { %p133_p8 = por %p132_p7, %p131_p6 }
  0x15   :  { %p134_p9 = pnand %p133_p8, %p127_p5 }
  0x17   :  { %137 = shalt.err (!%p134_p9)
}
  0x18   :  { %31 = dma.hbm_to_vmem [thread:$0]  %s194_s1, 128, %s29_s17, [#allocation6]  }
  0x19   :  { %158 = dma.done.wait [#allocation3], 256  }
  0x1a   :  { %159 = vsyncadd [#allocation3], 4294967040 }
  0x1b   :  { %160 = dma.done.wait [#allocation6], 128  }
  0x1c   :  { %161 = vsyncadd [#allocation6], 4294967168  ;;  %v38_v0 = vld [vmem:[#allocation5] sm:$0xff]  ;;  %v39_v1 = vld [vmem:[#allocation2] sm:$0xff]  ;;  %vm49_vm0 = vcmask 1043456   ;;  %v62_v13 = vlaneseq  ;;  %s168_s0 = smov [#allocation7]  }
  0x1d   :  { %v40_v2 = vld [vmem:[#allocation2 + $0x8] sm:$0xff]  ;;  %v41_v3 = vmul.f32 %v39_v1, %v38_v0  ;;  %s83_s1 = sshll.u32 %s168_s0, 4  ;;  %vm72_vm1 = vcmask 1041409   ;;  %vm75_vm2 = vcmask 25600   ;;  %s84_s1 = int_to_ptr.vmem [resolvable:$true] %s83_s1 }
  0x1e   :  { %v42_v4 = vmul.f32 %v40_v2, %v38_v0  ;;  %v63_v14 = vand.u32 127, %v62_v13  ;;  %v65_v15 = vshrl.u32 %v62_v13, 7  ;;  %s138_s21 = scalar_lea.vmem %s84_s1, 32  ;;  %p143_p11 = scmp.lt.s32.totalorder %s84_s1, %s84_s1 }
  0x1f   :  { %v45_v5 = vcombine.high %v41_v3, %v41_v3  ;;  %v50_v6 = vsel %vm49_vm0, %v41_v3, 0.0  ;;  %p139_p10 = scmp.ne.s32.totalorder %s84_s1, %s138_s21  ;;  %p144_p12 = scmp.lt.s32.totalorder %s138_s21, %s138_s21 }
  0x20   :  { %v46_v7 = vcombine.high %v42_v4, %v42_v4  ;;  %v55_v9 = vsel %vm49_vm0, %v42_v4, 0.0  ;;  %v66_v17 = vsub.s32 %v63_v14, %v65_v15 }
  0x21   :  { %v51_v8 = vsel %vm49_vm0, %v45_v5, 0.0  ;;  %p145_p13 = por %p144_p12, %p143_p11 }
  0x22   :  { %v56_v10 = vsel %vm49_vm0, %v46_v7, 0.0  ;;  %v52_v11 = vadd.f32 %v51_v8, %v50_v6 }
  0x23   :  { %v57_v12 = vadd.f32 %v56_v10, %v55_v9  ;;  %p146_p0 = pnand %p145_p13, %p139_p10 }
  0x24   :  { %53 = vadd.xlane.f32.xlu0 %v52_v11 }
  0x28   :  { %58 = vadd.xlane.f32.xlu0 %v57_v12 }
  0xad   :  { %v54_v16 = vpop.xlane.xlu0 %53 }
  0xae   :  { %v67_v19 = vrot.slane %v54_v16, %v66_v17 }
  0xb1   :  { %v59_v18 = vpop.xlane.xlu0 %58 }
  0xb2   :  { %v71_v20 = vrot.slane %v59_v18, %v66_v17 }
  0xb4   :  { %v73_v21 = vsel %vm72_vm1, %v71_v20, %v67_v19 }
  0xb5   :  { %76 = vst.msk [vmem:[#allocation7] sm:$0x3] %vm75_vm2, %v73_v21 }
  0xb6   :  { %149 = shalt.err (!%p146_p0)
}
  0xb7   :  { %86 = dma.vmem_to_hbm [thread:$0]  %s84_s1, 32, %s195_s2, [#allocation4]  }
  0xb8   :  { %162 = dma.done.wait [#allocation4], 32  }
  0xb9   :  { %163 = vsyncadd [#allocation4], 4294967264 }
  0xba   :  { %90 = vsyncpa [#allocation3], 1 }
  0xbb   :  { %91 = vsyncpa [#allocation6], 1 }
  0xbc   :  { %92 = vsyncpa [#allocation4], 1 }

</bundles_post_ra>
